<compile_context>
chip_gen: v6e
topology: v6e:2x2x1
jax: 0.10.0
libtpu: 0.0.40
codegen_flags: <defaults>
</compile_context>

<pallas_src>
import functools
import math

import jax
import jax.numpy as jnp
from jax.experimental import pallas as pl
from jax.experimental.pallas import tpu as pltpu


def _attention_kernel(w1_ref, w2_ref, x_ref, o_ref, *, nat):
    # w1_ref: (nat, D, D)  resident across grid
    # w2_ref: (Kout, D)    resident across grid
    # x_ref:  (D, TL)      one lane tile of the fused (D, B*L) slab
    # o_ref:  (Kout, TL)   lane-dense output tile
    t = x_ref[...]
    for i in range(nat):  # static unroll (nat <= 3); bn == 'no' => plain ReLU
        t = jnp.maximum(
            jnp.dot(w1_ref[i], t, preferred_element_type=jnp.float32), 0.0
        ).astype(x_ref.dtype)
    o_ref[...] = jnp.dot(
        w2_ref[...], t, preferred_element_type=jnp.float32
    ).astype(o_ref.dtype)


def attention_forward(x, w1_stack, w2, *, lane_tile=512):
    """x: (B, D, L); w1_stack: (nat, D, D); w2: (Kout, D) -> (B, Kout, L)."""
    B, D, L = x.shape
    nat = w1_stack.shape[0]
    Kout = w2.shape[0]
    N = B * L

    # Fold batch into the lane axis: (B, D, L) -> (D, B, L) -> (D, B*L).
    x2 = jnp.transpose(x, (1, 0, 2)).reshape(D, N)

    # Lane-tile the fused axis.  Small problems run as a single full-extent
    # block; larger ones use 512-lane tiles (multiple of 128), zero-padded
    # (zeros stay zero through relu/matmul and are sliced off afterwards).
    if N <= lane_tile:
        TL, Npad = N, N
    else:
        TL = lane_tile
        Npad = pl.cdiv(N, TL) * TL
        if Npad != N:
            x2 = jnp.pad(x2, ((0, 0), (0, Npad - N)))

    grid = (Npad // TL,)

    itemsize = x.dtype.itemsize
    cost = pl.CostEstimate(
        flops=2 * N * D * (nat * D + Kout),
        transcendentals=0,
        bytes_accessed=(D * N + Kout * N) * itemsize
        + w1_stack.size * w1_stack.dtype.itemsize
        + w2.size * w2.dtype.itemsize,
    )

    kernel = functools.partial(_attention_kernel, nat=nat)
    out2 = pl.pallas_call(
        kernel,
        out_shape=jax.ShapeDtypeStruct((Kout, Npad), x.dtype),
        grid_spec=pltpu.PrefetchScalarGridSpec(
            num_scalar_prefetch=0,
            grid=grid,
            in_specs=[
                pl.BlockSpec((nat, D, D), lambda j: (0, 0, 0)),  # W1 stack, resident
                pl.BlockSpec((Kout, D), lambda j: (0, 0)),       # W2, resident
                pl.BlockSpec((D, TL), lambda j: (0, j)),         # lane tile of x
            ],
            out_specs=pl.BlockSpec((Kout, TL), lambda j: (0, j)),
        ),
        compiler_params=pltpu.CompilerParams(
            dimension_semantics=("parallel",)),
        cost_estimate=cost,
    )(w1_stack, w2, x2)

    out2 = out2[:, :N]  # drop lane padding
    return jnp.transpose(out2.reshape(Kout, B, L), (1, 0, 2))  # (B, Kout, L)


def _xavier_uniform(key, shape, dtype=jnp.float32):
    fan_out, fan_in = shape
    bound = math.sqrt(6.0 / (fan_in + fan_out))
    return jax.random.uniform(key, shape, dtype, minval=-bound, maxval=bound)


def _reference(x, w1_stack, w2):
    t = x
    for i in range(w1_stack.shape[0]):
        t = jnp.maximum(jnp.einsum('kc,bcl->bkl', w1_stack[i], t), 0.0)
    return jnp.einsum('kc,bcl->bkl', w2, t)


def _run_case(key, B, mode_dims, L, att_type, nat):
    k_x, k_w1, k_w11, k_w12, k_w2 = jax.random.split(key, 5)
    x = jax.random.normal(k_x, (B, mode_dims, L), dtype=jnp.float32)

    w1_list = [_xavier_uniform(k_w1, (mode_dims, mode_dims))]
    if nat >= 2:
        w1_list.append(_xavier_uniform(k_w11, (mode_dims, mode_dims)))
    if nat >= 3:
        w1_list.append(_xavier_uniform(k_w12, (mode_dims, mode_dims)))
    w1_stack = jnp.stack(w1_list, axis=0)  # (nat, D, D)

    if att_type == 'whole':
        w2 = _xavier_uniform(k_w2, (1, mode_dims))          # (1, D)
    else:  # 'ele'
        w2 = _xavier_uniform(k_w2, (mode_dims, mode_dims))  # (D, D)

    out = jax.block_until_ready(attention_forward(x, w1_stack, w2))
    ref = _reference(x, w1_stack, w2)
    assert out.shape == ref.shape, (out.shape, ref.shape)
    assert jnp.allclose(out, ref, atol=1e-5, rtol=1e-5), "mismatch vs reference"


if __name__ == "__main__":
    key = jax.random.PRNGKey(0)
    k0, k1 = jax.random.split(key)

    # Default config: att_type='whole', nat=1 — single full-extent lane tile.
    _run_case(k0, B=2, mode_dims=32, L=8, att_type='whole', nat=1)

    # Tiled + padded lane path, 'ele' attention, nat=2.
    _run_case(k1, B=4, mode_dims=32, L=200, att_type='ele', nat=2)

    print("KERNEL_OK")
</pallas_src>

<mosaic_0001>
module attributes {stable_mosaic.version = 11 : i64} {
  func.func @_attention_kernel(%arg0: i32, %arg1: memref<1x32x32xf32, #tpu.memory_space<vmem>>, %arg2: memref<1x32xf32, #tpu.memory_space<vmem>>, %arg3: memref<32x16xf32, #tpu.memory_space<vmem>>, %arg4: memref<1x16xf32, #tpu.memory_space<vmem>>) attributes {dimension_semantics = [#tpu.dimension_semantics<parallel>], iteration_bounds = array<i64: 1>, scalar_prefetch = 0 : i64, scratch_operands = 0 : i64, tpu.core_type = #tpu.core_type<tc>, window_params = [{pipeline_mode = #tpu.pipeline_mode<synchronous>, transform_indices = @transform_0, window_bounds = array<i64: 1, 32, 32>}, {pipeline_mode = #tpu.pipeline_mode<synchronous>, transform_indices = @transform_1, window_bounds = array<i64: 1, 32>}, {transform_indices = @transform_2, window_bounds = array<i64: 32, 16>}, {transform_indices = @transform_3, window_bounds = array<i64: 1, 16>}]} {
    %c0 = arith.constant 0 : index
    %c0_0 = arith.constant 0 : index
    %0 = vector.load %arg3[%c0, %c0_0] : memref<32x16xf32, #tpu.memory_space<vmem>>, vector<32x16xf32>
    %c0_1 = arith.constant 0 : index
    %c0_2 = arith.constant 0 : index
    %c0_3 = arith.constant 0 : index
    %1 = vector.load %arg1[%c0_1, %c0_2, %c0_3] : memref<1x32x32xf32, #tpu.memory_space<vmem>>, vector<1x32x32xf32>
    %2 = vector.shape_cast %1 : vector<1x32x32xf32> to vector<32x32xf32>
    %cst = arith.constant dense<0.000000e+00> : vector<32x16xf32>
    %3 = tpu.matmul %2, %0, %cst {dimension_numbers = #tpu.dot_dimension_numbers<[1], [0], [0], [1], [0, 0, 1, 1], [], []>} : vector<32x32xf32>, vector<32x16xf32>, vector<32x16xf32> -> vector<32x16xf32>
    %cst_4 = arith.constant 0.000000e+00 : f32
    %4 = vector.broadcast %cst_4 : f32 to vector<32x16xf32>
    %5 = arith.maximumf %3, %4 : vector<32x16xf32>
    %c0_5 = arith.constant 0 : index
    %c0_6 = arith.constant 0 : index
    %6 = vector.load %arg2[%c0_5, %c0_6] : memref<1x32xf32, #tpu.memory_space<vmem>>, vector<1x32xf32>
    %cst_7 = arith.constant dense<0.000000e+00> : vector<1x16xf32>
    %7 = tpu.matmul %6, %5, %cst_7 {dimension_numbers = #tpu.dot_dimension_numbers<[1], [0], [0], [1], [0, 0, 1, 1], [], []>} : vector<1x32xf32>, vector<32x16xf32>, vector<1x16xf32> -> vector<1x16xf32>
    %c0_8 = arith.constant 0 : index
    %c0_9 = arith.constant 0 : index
    %8 = vector.load %arg4[%c0_8, %c0_9] : memref<1x16xf32, #tpu.memory_space<vmem>>, vector<1x16xf32>
    tpu.vector_store %arg4[%c0_8, %c0_9], %7 {strides = array<i32>} : memref<1x16xf32, #tpu.memory_space<vmem>>, vector<1x16xf32>,
    return
  }
  func.func @transform_0(%arg0: i32) -> (i32, i32, i32) {
    %c0_i32 = arith.constant 0 : i32
    %c0_i32_0 = arith.constant 0 : i32
    %c0_i32_1 = arith.constant 0 : i32
    %c0_i32_2 = arith.constant 0 : i32
    return %c0_i32, %c0_i32_0, %c0_i32_1 : i32, i32, i32
  }
  func.func @transform_1(%arg0: i32) -> (i32, i32) {
    %c0_i32 = arith.constant 0 : i32
    %c0_i32_0 = arith.constant 0 : i32
    %c0_i32_1 = arith.constant 0 : i32
    return %c0_i32, %c0_i32_0 : i32, i32
  }
  func.func @transform_2(%arg0: i32) -> (i32, i32) {
    %c0_i32 = arith.constant 0 : i32
    %c0_i32_0 = arith.constant 0 : i32
    return %c0_i32, %arg0 : i32, i32
  }
  func.func @transform_3(%arg0: i32) -> (i32, i32) {
    %c0_i32 = arith.constant 0 : i32
    %c0_i32_0 = arith.constant 0 : i32
    return %c0_i32, %arg0 : i32, i32
  }
}

</mosaic_0001>

<bundles_post_ra>
// kernel: tpu_custom_call.1
= control target key start
LH: loop header
LB: loop body
LE: loop exit
PB: predicated region body
PF: predicated region fallthrough
CT: control target
= control target key end

     0   :  { %vm23_vm0 = vcmask 261120   ;;  %s341_s0 = inlined_call_operand.vmem [shape: f32[1,32,32], index: 0, kind: input, shape index: {}]   ;;  %s342_s1 = inlined_call_operand.vmem [shape: f32[1,32], index: 1, kind: input, shape index: {}]   ;;  %s343_s2 = inlined_call_operand.vmem [shape: f32[32,16], index: 2, kind: input, shape index: {}]   ;;  %s344_s3 = inlined_call_operand.hbm [shape: f32[1,16], index: 3, kind: output, shape index: {}]  }
   0x1   :  { %v18_v0 = vld [vmem:[%s343_s2 + $0x18] sm:$0xff]  ;;  %v17_v1 = vld [vmem:[%s343_s2 + $0x10] sm:$0xff]  ;;  %v19_v2 = vld [vmem:[%s341_s0] sm:$0xff] }
   0x2   :  { %233 = vmatprep.subr.mxu0 %v18_v0  ;;  %v16_v3 = vld [vmem:[%s343_s2 + $0x8] sm:$0xff]  ;;  %241 = vmatprep.mubr.msk.f32.mxu0 %vm23_vm0, %v19_v2 }
   0x3   :  { %234 = vmatpush3.msra.mxu0 %v18_v0 }
   0x4   :  { %8 = vsyncpa [#allocation3], 0  ;;  %235 = vmatprep.subr.mxu0 %v17_v1  ;;  %v15_v4 = vld [vmem:[%s343_s2] sm:$0xff]  ;;  %v20_v5 = vld [vmem:[%s341_s0 + $0x8] sm:$0xff]  ;;  %v283_v8 = vmov 0.0   ;;  %vm284_vm1 = vmmov 0  }
   0x5   :  { %236 = vmatpush3.msra.mxu0 %v17_v1  ;;  %v21_v6 = vld [vmem:[%s341_s0 + $0x10] sm:$0xff]  ;;  %v22_v7 = vld [vmem:[%s341_s0 + $0x18] sm:$0xff]  ;;  %247 = vmatprep.subr.mxu1 %v283_v8  ;;  %v125_v17 = vld [vmem:[%s342_s1] sm:$0x1]  ;;  %s285_s28 = smov [#allocation2]   ;;  %vm199_vm2 = vcmask 122880  }
   0x6   :  { %237 = vmatprep.subr.mxu0 %v16_v3  ;;  %255 = vmatprep.mubr.msk.f32.mxu1 %vm284_vm1, %v283_v8  ;;  %s207_s29 = sshll.u32 %s285_s28, 4  ;;  %s208_s29 = int_to_ptr.vmem [resolvable:$true] %s207_s29 }
   0x7   :  { %238 = vmatpush3.msra.mxu0 %v16_v3  ;;  %s261_s30 = scalar_lea.vmem %s208_s29, 16  ;;  %s265_s4 = scalar_lea.vmem %s208_s29, 32 }
   0x8   :  { %239 = vmatprep.subr.mxu0 %v15_v4  ;;  %p262_p0 = scmp.ne.s32.totalorder %s208_s29, %s261_s30  ;;  %p266_p1 = scmp.lt.s32.totalorder %s208_s29, %s208_s29 }
   0x9   :  { %240 = vmatpush3.msra.mxu0 %v15_v4  ;;  %p267_p2 = scmp.lt.s32.totalorder %s265_s4, %s261_s30 }
   0xa   :  { %242 = vmatmul.mubr.msk.f32.vlgmr.msra.gmra.mxu0 %vm23_vm0, %v20_v5 }
   0xb   :  { %244 = vmatprep.mubr.msk.f32.mxu0 %vm23_vm0, %v21_v6  ;;  %p268_p3 = por %p267_p2, %p266_p1 }
   0xd   :  { %p269_p4 = pnand %p268_p3, %p262_p0 }
   0xe   :  { %245 = vmatmul.mubr.msk.f32.gmra.mxu0 %vm23_vm0, %v22_v7 }
  0xca   :  { %v243_v9 = vpop.f32.mrf.mxu0 }
  0xcb   :  { %v122_v15 = vmax.f32 %v243_v9, 0.0 }
  0xcc   :  { %v102_v10 = vpop.f32.mrf.mxu0 }
  0xcd   :  { %v121_v16 = vmax.f32 %v102_v10, 0.0 }
  0xce   :  { %v246_v11 = vpop.f32.mrf.mxu0 }
  0xcf   :  { %v124_v12 = vmax.f32 %v246_v11, 0.0 }
  0xd0   :  { %v112_v13 = vpop.f32.mrf.mxu0 }
  0xd1   :  { %v123_v14 = vmax.f32 %v112_v13, 0.0  ;;  %248 = vmatpush3.msra.mxu1 %v124_v12 }
  0xd2   :  { %249 = vmatprep.subr.mxu1 %v283_v8 }
  0xd3   :  { %250 = vmatpush3.msra.mxu1 %v123_v14 }
  0xd4   :  { %251 = vmatprep.subr.mxu1 %v283_v8 }
  0xd5   :  { %252 = vmatpush3.msra.mxu1 %v122_v15 }
  0xd6   :  { %253 = vmatprep.subr.mxu1 %v283_v8 }
  0xd7   :  { %254 = vmatpush3.msra.mxu1 %v121_v16 }
  0xd8   :  { %256 = vmatmul.mubr.msk.f32.vlgmr.msra.gmra.mxu1 %vm23_vm0, %v125_v17 }
 0x198   :  { %v195_v18 = vpop.f32.mrf.mxu1 }
 0x199   :  { %200 = vst.msk [vmem:[#allocation2] sm:$0x1] %vm199_vm2, %v195_v18 }
 0x19a   :  { %v257_v19 = vpop.f32.mrf.mxu1 }
 0x19b   :  { %272 = shalt.err (!%p269_p4)
}
 0x19c   :  { %210 = dma.vmem_to_hbm [thread:$0]  %s208_s29, 16, %s344_s3, [#allocation3]  }
 0x19d   :  { %281 = dma.done.wait [#allocation3], 16  }
 0x19e   :  { %282 = vsyncadd [#allocation3], 4294967280 }
 0x19f   :  { %214 = vsyncpa [#allocation3], 1 }

</bundles_post_ra>
